<compile_context>
chip_gen: v6e
topology: v6e:2x2x1
jax: 0.10.0
libtpu: 0.0.40
codegen_flags: <defaults>
</compile_context>

<pallas_src>
import functools

import jax
import jax.numpy as jnp
from jax import lax
from jax.experimental import pallas as pl
from jax.experimental.pallas import tpu as pltpu


def attention_kernel(x_ref, w_ref, o_ref, m_sc, l_sc, acc_sc, *,
                     seq_len, mask_tail):
    # x_ref: (tb, ts, E) native dtype;  w_ref: (1, E);  o_ref: (tb, E)
    # scratch: m_sc (tb,1) f32, l_sc (tb,1) f32, acc_sc (tb,E) f32
    s_idx = pl.program_id(1)
    n_s = pl.num_programs(1)

    @pl.when(s_idx == 0)
    def _init():
        m_sc[...] = jnp.full_like(m_sc, -jnp.inf)
        l_sc[...] = jnp.zeros_like(l_sc)
        acc_sc[...] = jnp.zeros_like(acc_sc)

    x = x_ref[...]                                   # (tb, ts, E) native dtype
    w = w_ref[...].astype(x.dtype)                   # (1, E)

    # attention_scores = x @ w^T, computed on the VPU (broadcast mul) + XLU
    # lane reduce, accumulated in f32 without materializing an f32 x tile.
    scores = jnp.sum(x * w[None, :, :], axis=-1, keepdims=True,
                     dtype=jnp.float32)              # (tb, ts, 1)

    ts = x.shape[1]
    if mask_tail:
        pos = s_idx * ts + lax.broadcasted_iota(jnp.int32, scores.shape, 1)
        valid = pos < seq_len                        # (tb, ts, 1)
        scores = jnp.where(valid, scores, -jnp.inf)

    # Online softmax update over the sequence (grid axis 1).
    m_prev = m_sc[...]                               # (tb, 1)
    m_new = jnp.maximum(m_prev, jnp.max(scores, axis=1))
    alpha = jnp.exp(m_prev - m_new)                  # (tb, 1); 0 on first chunk
    e = jnp.exp(scores - m_new[:, None, :])          # (tb, ts, 1) f32

    xe = x * e.astype(x.dtype)                       # (tb, ts, E) native dtype
    if mask_tail:
        # Select (not multiply) so garbage tail reads can never poison valid rows.
        xe = jnp.where(valid, xe, jnp.zeros((), xe.dtype))

    l_sc[...] = alpha * l_sc[...] + jnp.sum(e, axis=1)                     # (tb, 1)
    acc_sc[...] = alpha * acc_sc[...] + jnp.sum(xe, axis=1, dtype=jnp.float32)
    m_sc[...] = m_new

    @pl.when(s_idx == n_s - 1)
    def _finalize():
        # Exact reciprocal (approx=True would strain the 1e-5 tolerance).
        o_ref[...] = (acc_sc[...] *
                      pl.reciprocal(l_sc[...], approx=False)).astype(o_ref.dtype)


_DEFAULT_BUDGET = 8 * 1024 * 1024   # per-tile working-set budget, all TPU gens


def _choose_tiles(B, S, E, itemsize, budget_bytes):
    """Pick (tb, ts): batch tile and sequence tile."""
    # Per tile element: the natively-typed x tile is double buffered by the
    # BlockSpec pipeline (2 * itemsize) plus roughly two f32-sized elementwise
    # temporaries (~8 B) live in the kernel body.
    bytes_per_elem = 2 * itemsize + 8
    max_elems = max(1, budget_bytes // bytes_per_elem)

    row_elems = S * E
    tb_cap = max_elems // row_elems          # full-sequence rows that fit

    if tb_cap >= min(B, 8):
        # Whole sequence fits per step: tile over batch only.
        tb = B if tb_cap >= B else max(8, (tb_cap // 8) * 8)
        # Keep >=2 batch grid steps when B allows two multiple-of-8 blocks so
        # the "parallel" axis can shard across v7x's 2 TensorCores (no cost on
        # single-TC v5e/v6e).
        if B >= 16:
            tb = min(tb, max(8, ((B // 2) // 8) * 8))
        # Prefer a nearby tb that divides B (avoids a partial tail block),
        # without shrinking the tile by more than ~2x.
        if tb < B and B % tb != 0:
            for cand in range(tb, max(7, tb // 2 - 1), -8):
                if B % cand == 0:
                    tb = cand
                    break
        ts = S
    else:
        # Even 8 full-sequence rows blow the budget: tile the sequence too and
        # rely on the online-softmax accumulation across the S grid axis.
        tb = min(B, 8)
        ts_cap = max(1, max_elems // (tb * E))
        ts = min(S, max(8, (ts_cap // 8) * 8))
        # TODO(synk): add an E (lane) tiling axis for embed dims so large that
        # even a (8, 8, E) tile exceeds the budget.
    return tb, ts


def attention_mechanism(x, w_row, *, budget_bytes=_DEFAULT_BUDGET):
    """x: (B, S, E); w_row: (1, E) = nn.Linear(E, 1, bias=False).weight. -> (B, E)."""
    B, S, E = x.shape
    assert w_row.shape == (1, E)
    itemsize = jnp.dtype(x.dtype).itemsize

    tb, ts = _choose_tiles(B, S, E, itemsize, budget_bytes)
    n_b = pl.cdiv(B, tb)
    n_s = pl.cdiv(S, ts)
    mask_tail = (n_s * ts) != S

    kernel = functools.partial(attention_kernel, seq_len=S, mask_tail=mask_tail)

    # Deeper input buffering only pays off on long grids with small tiles.
    x_tile_bytes = tb * ts * E * itemsize
    if n_b * n_s >= 8 and x_tile_bytes < 4 * 1024 * 1024:
        x_spec = pl.BlockSpec((tb, ts, E), lambda b, s: (b, s, 0),
                              pipeline_mode=pl.Buffered(3))
    else:
        x_spec = pl.BlockSpec((tb, ts, E), lambda b, s: (b, s, 0))

    return pl.pallas_call(
        kernel,
        out_shape=jax.ShapeDtypeStruct((B, E), x.dtype),
        grid_spec=pltpu.PrefetchScalarGridSpec(
            num_scalar_prefetch=0,
            grid=(n_b, n_s),
            in_specs=[
                x_spec,
                pl.BlockSpec((1, E), lambda b, s: (0, 0)),   # lane-dense weight row
            ],
            out_specs=pl.BlockSpec((tb, E), lambda b, s: (b, 0)),
            scratch_shapes=[
                pltpu.VMEM((tb, 1), jnp.float32),   # running max m
                pltpu.VMEM((tb, 1), jnp.float32),   # running denom l
                pltpu.VMEM((tb, E), jnp.float32),   # running weighted sum
            ],
        ),
        compiler_params=pltpu.CompilerParams(
            dimension_semantics=("parallel", "arbitrary"),
            # Above the 16 MiB v5e scoped default, well under v7x's 64 MiB VMEM.
            vmem_limit_bytes=32 * 1024 * 1024,
        ),
        cost_estimate=pl.CostEstimate(
            flops=4 * B * S * E,
            transcendentals=B * S,
            bytes_accessed=B * S * E * itemsize + B * E * itemsize + E * itemsize,
        ),
    )(x, w_row)


def attention_reference(x, w_row):
    # Pure-JAX reference mirroring the PyTorch module exactly.
    scores = jnp.squeeze(x @ w_row.T, axis=-1)         # (B, S)
    weights = jax.nn.softmax(scores, axis=1)           # (B, S)
    return jnp.sum(x * weights[..., None], axis=1)     # (B, E)


if __name__ == "__main__":
    B, S, E = 2, 8, 32
    key = jax.random.PRNGKey(0)
    kx, kw = jax.random.split(key)
    x = jax.random.normal(kx, (B, S, E), dtype=jnp.float32)
    # nn.Linear(embed_dim, 1, bias=False).weight has shape (1, E); use directly.
    w_row = jax.random.normal(kw, (1, E), dtype=jnp.float32) * (1.0 / jnp.sqrt(E))

    out = attention_mechanism(x, w_row)
    out = jax.block_until_ready(out)

    ref = attention_reference(x, w_row)
    assert out.shape == (B, E)
    assert jnp.allclose(out, ref, atol=1e-5, rtol=1e-5), "mismatch vs reference"

    print("KERNEL_OK")
</pallas_src>

<mosaic_0001>
module attributes {stable_mosaic.version = 11 : i64} {
  func.func @attention_kernel(%arg0: i32, %arg1: i32, %arg2: memref<2x8x32xf32, #tpu.memory_space<vmem>>, %arg3: memref<1x32xf32, #tpu.memory_space<vmem>>, %arg4: memref<2x32xf32, #tpu.memory_space<vmem>>, %arg5: memref<2x1xf32, #tpu.memory_space<vmem>>, %arg6: memref<2x1xf32, #tpu.memory_space<vmem>>, %arg7: memref<2x32xf32, #tpu.memory_space<vmem>>) attributes {dimension_semantics = [#tpu.dimension_semantics<parallel>, #tpu.dimension_semantics<arbitrary>], iteration_bounds = array<i64: 1, 1>, scalar_prefetch = 0 : i64, scratch_operands = 3 : i64, tpu.core_type = #tpu.core_type<tc>, window_params = [{transform_indices = @transform_0, window_bounds = array<i64: 2, 8, 32>}, {pipeline_mode = #tpu.pipeline_mode<synchronous>, transform_indices = @transform_1, window_bounds = array<i64: 1, 32>}, {transform_indices = @transform_2, window_bounds = array<i64: 2, 32>}]} {
    %c0_i32 = arith.constant 0 : i32
    %0 = arith.cmpi eq, %arg1, %c0_i32 : i32
    %1 = arith.extui %0 : i1 to i32
    %c0_i32_0 = arith.constant 0 : i32
    %2 = arith.cmpi ne, %1, %c0_i32_0 : i32
    scf.if %2 {
      %cst_22 = arith.constant 0xFF800000 : f32
      %36 = vector.broadcast %cst_22 : f32 to vector<2x1xf32>
      %c0_23 = arith.constant 0 : index
      %c0_24 = arith.constant 0 : index
      %37 = vector.load %arg5[%c0_23, %c0_24] : memref<2x1xf32, #tpu.memory_space<vmem>>, vector<2x1xf32>
      tpu.vector_store %arg5[%c0_23, %c0_24], %36 {strides = array<i32>} : memref<2x1xf32, #tpu.memory_space<vmem>>, vector<2x1xf32>,
      %cst_25 = arith.constant 0.000000e+00 : f32
      %38 = vector.broadcast %cst_25 : f32 to vector<2x1xf32>
      %c0_26 = arith.constant 0 : index
      %c0_27 = arith.constant 0 : index
      %39 = vector.load %arg6[%c0_26, %c0_27] : memref<2x1xf32, #tpu.memory_space<vmem>>, vector<2x1xf32>
      tpu.vector_store %arg6[%c0_26, %c0_27], %38 {strides = array<i32>} : memref<2x1xf32, #tpu.memory_space<vmem>>, vector<2x1xf32>,
      %cst_28 = arith.constant 0.000000e+00 : f32
      %40 = vector.broadcast %cst_28 : f32 to vector<2x32xf32>
      %c0_29 = arith.constant 0 : index
      %c0_30 = arith.constant 0 : index
      %41 = vector.load %arg7[%c0_29, %c0_30] : memref<2x32xf32, #tpu.memory_space<vmem>>, vector<2x32xf32>
      tpu.vector_store %arg7[%c0_29, %c0_30], %40 {strides = array<i32>} : memref<2x32xf32, #tpu.memory_space<vmem>>, vector<2x32xf32>,
    } else {
    }
    %c0 = arith.constant 0 : index
    %c0_1 = arith.constant 0 : index
    %c0_2 = arith.constant 0 : index
    %3 = vector.load %arg2[%c0, %c0_1, %c0_2] : memref<2x8x32xf32, #tpu.memory_space<vmem>>, vector<2x8x32xf32>
    %c0_3 = arith.constant 0 : index
    %c0_4 = arith.constant 0 : index
    %4 = vector.load %arg3[%c0_3, %c0_4] : memref<1x32xf32, #tpu.memory_space<vmem>>, vector<1x32xf32>
    %5 = vector.shape_cast %4 : vector<1x32xf32> to vector<1x1x32xf32>
    %6 = vector.broadcast %5 : vector<1x1x32xf32> to vector<2x8x32xf32>
    %7 = arith.mulf %3, %6 : vector<2x8x32xf32>
    %cst = arith.constant dense<0.000000e+00> : vector<2x8xf32>
    %8 = vector.multi_reduction <add>, %7, %cst [2] : vector<2x8x32xf32> to vector<2x8xf32>
    %9 = vector.shape_cast %8 : vector<2x8xf32> to vector<2x8x1xf32>
    %c0_5 = arith.constant 0 : index
    %c0_6 = arith.constant 0 : index
    %10 = vector.load %arg5[%c0_5, %c0_6] : memref<2x1xf32, #tpu.memory_space<vmem>>, vector<2x1xf32>
    %cst_7 = arith.constant dense<0xFF800000> : vector<2x1xf32>
    %11 = vector.multi_reduction <maximumf>, %9, %cst_7 [1] : vector<2x8x1xf32> to vector<2x1xf32>
    %12 = arith.maximumf %10, %11 : vector<2x1xf32>
    %13 = arith.subf %10, %12 : vector<2x1xf32>
    %14 = math.exp %13 : vector<2x1xf32>
    %15 = vector.shape_cast %12 : vector<2x1xf32> to vector<2x1x1xf32>
    %16 = vector.broadcast %15 : vector<2x1x1xf32> to vector<2x8x1xf32>
    %17 = arith.subf %9, %16 : vector<2x8x1xf32>
    %18 = math.exp %17 : vector<2x8x1xf32>
    %19 = vector.broadcast %18 : vector<2x8x1xf32> to vector<2x8x32xf32>
    %20 = arith.mulf %3, %19 : vector<2x8x32xf32>
    %c0_8 = arith.constant 0 : index
    %c0_9 = arith.constant 0 : index
    %21 = vector.load %arg6[%c0_8, %c0_9] : memref<2x1xf32, #tpu.memory_space<vmem>>, vector<2x1xf32>
    %22 = arith.mulf %14, %21 : vector<2x1xf32>
    %cst_10 = arith.constant dense<0.000000e+00> : vector<2x1xf32>
    %23 = vector.multi_reduction <add>, %18, %cst_10 [1] : vector<2x8x1xf32> to vector<2x1xf32>
    %24 = arith.addf %22, %23 : vector<2x1xf32>
    %c0_11 = arith.constant 0 : index
    %c0_12 = arith.constant 0 : index
    %25 = vector.load %arg6[%c0_11, %c0_12] : memref<2x1xf32, #tpu.memory_space<vmem>>, vector<2x1xf32>
    tpu.vector_store %arg6[%c0_11, %c0_12], %24 {strides = array<i32>} : memref<2x1xf32, #tpu.memory_space<vmem>>, vector<2x1xf32>,
    %c0_13 = arith.constant 0 : index
    %c0_14 = arith.constant 0 : index
    %26 = vector.load %arg7[%c0_13, %c0_14] : memref<2x32xf32, #tpu.memory_space<vmem>>, vector<2x32xf32>
    %27 = vector.broadcast %14 : vector<2x1xf32> to vector<2x32xf32>
    %28 = arith.mulf %27, %26 : vector<2x32xf32>
    %cst_15 = arith.constant dense<0.000000e+00> : vector<2x32xf32>
    %29 = vector.multi_reduction <add>, %20, %cst_15 [1] : vector<2x8x32xf32> to vector<2x32xf32>
    %30 = arith.addf %28, %29 : vector<2x32xf32>
    %c0_16 = arith.constant 0 : index
    %c0_17 = arith.constant 0 : index
    %31 = vector.load %arg7[%c0_16, %c0_17] : memref<2x32xf32, #tpu.memory_space<vmem>>, vector<2x32xf32>
    tpu.vector_store %arg7[%c0_16, %c0_17], %30 {strides = array<i32>} : memref<2x32xf32, #tpu.memory_space<vmem>>, vector<2x32xf32>,
    %c0_18 = arith.constant 0 : index
    %c0_19 = arith.constant 0 : index
    %32 = vector.load %arg5[%c0_18, %c0_19] : memref<2x1xf32, #tpu.memory_space<vmem>>, vector<2x1xf32>
    tpu.vector_store %arg5[%c0_18, %c0_19], %12 {strides = array<i32>} : memref<2x1xf32, #tpu.memory_space<vmem>>, vector<2x1xf32>,
    %c0_i32_20 = arith.constant 0 : i32
    %33 = arith.cmpi eq, %arg1, %c0_i32_20 : i32
    %34 = arith.extui %33 : i1 to i32
    %c0_i32_21 = arith.constant 0 : i32
    %35 = arith.cmpi ne, %34, %c0_i32_21 : i32
    scf.if %35 {
      %c0_22 = arith.constant 0 : index
      %c0_23 = arith.constant 0 : index
      %36 = vector.load %arg7[%c0_22, %c0_23] : memref<2x32xf32, #tpu.memory_space<vmem>>, vector<2x32xf32>
      %c0_24 = arith.constant 0 : index
      %c0_25 = arith.constant 0 : index
      %37 = vector.load %arg6[%c0_24, %c0_25] : memref<2x1xf32, #tpu.memory_space<vmem>>, vector<2x1xf32>
      %38 = tpu.reciprocal %37 : vector<2x1xf32> -> vector<2x1xf32>
      %39 = vector.broadcast %38 : vector<2x1xf32> to vector<2x32xf32>
      %40 = arith.mulf %36, %39 : vector<2x32xf32>
      %c0_26 = arith.constant 0 : index
      %c0_27 = arith.constant 0 : index
      %41 = vector.load %arg4[%c0_26, %c0_27] : memref<2x32xf32, #tpu.memory_space<vmem>>, vector<2x32xf32>
      tpu.vector_store %arg4[%c0_26, %c0_27], %40 {strides = array<i32>} : memref<2x32xf32, #tpu.memory_space<vmem>>, vector<2x32xf32>,
    } else {
    }
    return
  }
  func.func @transform_0(%arg0: i32, %arg1: i32) -> (i32, i32, i32) {
    %c0_i32 = arith.constant 0 : i32
    %c0_i32_0 = arith.constant 0 : i32
    return %arg0, %arg1, %c0_i32 : i32, i32, i32
  }
  func.func @transform_1(%arg0: i32, %arg1: i32) -> (i32, i32) {
    %c0_i32 = arith.constant 0 : i32
    %c0_i32_0 = arith.constant 0 : i32
    %c0_i32_1 = arith.constant 0 : i32
    return %c0_i32, %c0_i32_0 : i32, i32
  }
  func.func @transform_2(%arg0: i32, %arg1: i32) -> (i32, i32) {
    %c0_i32 = arith.constant 0 : i32
    %c0_i32_0 = arith.constant 0 : i32
    return %arg0, %c0_i32 : i32, i32
  }
}

</mosaic_0001>

<bundles_post_ra>
// kernel: tpu_custom_call.1
= control target key start
LH: loop header
LB: loop body
LE: loop exit
PB: predicated region body
PF: predicated region fallthrough
CT: control target
= control target key end

     0   :  { %7 = vsyncpa [#allocation6], 0  ;;  %s324_s0 = inlined_call_operand.hbm [shape: f32[2,8,32], index: 0, kind: input, shape index: {}]   ;;  %s325_s1 = inlined_call_operand.vmem [shape: f32[1,32], index: 1, kind: input, shape index: {}]   ;;  %s326_s2 = inlined_call_operand.hbm [shape: f32[2,32], index: 2, kind: output, shape index: {}]  }
   0x1   :  { %8 = vsyncpa [#allocation7], 0  ;;  %s270_s9 = smov [#allocation5]  }
   0x2   :  { %s14_s10 = sshll.u32 %s270_s9, 4  ;;  %s15_s10 = int_to_ptr.vmem [resolvable:$true] %s14_s10 }
   0x3   :  { %s234_s11 = scalar_lea.vmem %s15_s10, 256  ;;  %p239_p1 = scmp.lt.s32.totalorder %s15_s10, %s15_s10 }
   0x4   :  { %p235_p0 = scmp.ne.s32.totalorder %s15_s10, %s234_s11  ;;  %p240_p2 = scmp.lt.s32.totalorder %s234_s11, %s234_s11 }
   0x6   :  { %p241_p3 = por %p240_p2, %p239_p1 }
   0x8   :  { %p242_p4 = pnand %p241_p3, %p235_p0 }
   0xa   :  { %245 = shalt.err (!%p242_p4)
}
   0xb   :  { %s271_s12 = smov 128   ;;  %s272_s13 = smov 8  }
   0xc   :  { %20 = dma.hbm_to_vmem [thread:$0]  %s324_s0, 256, %s15_s10, [#allocation6], %s271_s12, %s271_s12, %s272_s13  }
   0xd   :  { %266 = dma.done.wait [#allocation6], 256  }
   0xe   :  { %267 = vsyncadd [#allocation6], 4294967040  ;;  %v296_v0 = vld [vmem:[#allocation5] sm:$0xff]  ;;  %v207_v1 = vld [vmem:[%s325_s1] ss:$0 sm:$0xff]  ;;  %vm46_vm0 = vcmask 261120   ;;  %v79_v20 = vlaneseq }
   0xf   :  { %v301_v2 = vld [vmem:[#allocation5 + $0x8] sm:$0xff]  ;;  %v44_v3 = vmul.f32 %v207_v1, %v296_v0  ;;  %vm30_vm1 = vcmask 1024   ;;  %v273_v7 = vmov -inf   ;;  %v274_v8 = vmov 0.0   ;;  %s277_s0 = smov [#allocation8]  }
  0x10   :  { %v45_v4 = vmul.f32 %v207_v1, %v301_v2  ;;  %31 = vst.msk [vmem:[#allocation2] sm:$0x3] %vm30_vm1, %v273_v7  ;;  %32 = vst.msk [vmem:[#allocation3] sm:$0x3] %vm30_vm1, %v274_v8  ;;  %v275_v9 = vmov 0   ;;  %vm33_vm2 = vcmask 254976  }
  0x11   :  { %v47_v5 = vsel %vm46_vm0, %v44_v3, 0.0  ;;  %217 = vset.pattern.permute.xlu0 %v275_v9  ;;  %216 = vset.pattern.permute.xlu1 %v275_v9  ;;  %34 = vst.msk [vmem:[#allocation4] sm:$0x3] %vm33_vm2, %v274_v8  ;;  %v276_v18 = vmov 1966171168   ;;  %v80_v25 = vshrl.u32 %v79_v20, 7 }
  0x12   :  { %48 = vadd.xlane.f32.xlu0 %v47_v5  ;;  %v50_v6 = vsel %vm46_vm0, %v45_v4, 0.0  ;;  %v77_v19 = vunpack.c.l.s4 %v276_v18  ;;  %vm68_vm3 = vcmask 1041409   ;;  %vm128_vm4 = vcmask 7168   ;;  %s198_s1 = sshll.u32 %s277_s0, 4  ;;  %s199_s1 = int_to_ptr.vmem [resolvable:$true] %s198_s1 }
  0x13   :  { %v100_v33 = vsub.s32 0, %v80_v25  ;;  %s246_s18 = scalar_lea.vmem %s199_s1, 32  ;;  %p251_p6 = scmp.lt.s32.totalorder %s199_s1, %s199_s1 }
  0x14   :  { %v78_v24 = vunpack.c.0.s8 %v77_v19  ;;  %p247_p5 = scmp.ne.s32.totalorder %s199_s1, %s246_s18  ;;  %p252_p7 = scmp.lt.s32.totalorder %s246_s18, %s246_s18 }
  0x16   :  { %51 = vadd.xlane.f32.xlu0 %v50_v6  ;;  %v81_v30 = vsub.s32 %v78_v24, %v80_v25  ;;  %p253_p8 = por %p252_p7, %p251_p6 }
  0x17   :  { %v53_v28 = vld [vmem:[#allocation2] sm:$0x3]  ;;  %v126_v60 = vld [vmem:[#allocation3] sm:$0x3] }
  0x18   :  { %p254_p9 = pnand %p253_p8, %p247_p5 }
  0x9b   :  { %v49_v10 = vpop.xlane.xlu0 %48 }
  0x9c   :  { %v54_v11 = vrot.slane %v49_v10, 4 }
  0x9e   :  { %v55_v12 = vmax.f32 %v49_v10, %v54_v11 }
  0x9f   :  { %v52_v13 = vpop.xlane.xlu0 %51 }
  0xa0   :  { %v56_v14 = vrot.slane %v55_v12, 2  ;;  %v60_v15 = vrot.slane %v52_v13, 4 }
  0xa2   :  { %v57_v16 = vmax.f32 %v55_v12, %v56_v14  ;;  %v61_v17 = vmax.f32 %v52_v13, %v60_v15 }
  0xa4   :  { %v62_v21 = vrot.slane %v61_v17, 2  ;;  %v58_v22 = vrot.slane %v57_v16, 1 }
  0xa6   :  { %v63_v23 = vmax.f32 %v61_v17, %v62_v21  ;;  %v59_v27 = vmax.f32 %v57_v16, %v58_v22  ;;  %v150_v22 = vld [vmem:[#allocation4] sm:$0x3] }
  0xa8   :  { %v64_v26 = vrot.slane %v63_v23, 1 }
  0xaa   :  { %v65_v29 = vmax.f32 %v63_v23, %v64_v26 }
  0xac   :  { %v69_v31 = vsel %vm68_vm3, %v65_v29, %v59_v27 }
  0xad   :  { %v71_v32 = vmax.f32 %v53_v28, %v69_v31 }
  0xaf   :  { %v72_v34 = vsub.f32 %v53_v28, %v71_v32  ;;  %v82_v35 = vrot.slane %v71_v32, %v81_v30  ;;  %178 = vst.msk [vmem:[#allocation2] sm:$0x3] %vm30_vm1, %v71_v32 }
  0xb1   :  { %v73_v36 = vmul.f32 1.442695, %v72_v34  ;;  %v83_v37 = vcombine.high %v82_v35, %v82_v35  ;;  %v90_v38 = vrot.slane %v82_v35, %v81_v30 }
  0xb3   :  { %218 = vpow2.f32 %v73_v36  ;;  %v97_v39 = vrot.slane %v83_v37, %v81_v30  ;;  %v101_v40 = vrot.slane %v90_v38, %v100_v33 }
  0xb5   :  { %v105_v41 = vrot.slane %v97_v39, %v100_v33  ;;  %v108_v42 = vsub.f32 %v49_v10, %v101_v40 }
  0xb7   :  { %v109_v43 = vsub.f32 %v52_v13, %v105_v41  ;;  %v110_v44 = vmul.f32 1.442695, %v108_v42 }
  0xb9   :  { %220 = vpow2.f32 %v110_v44  ;;  %v112_v45 = vmul.f32 1.442695, %v109_v43 }
  0xbb   :  { %222 = vpow2.f32 %v112_v45 }
  0xc0   :  { %v219_v46 = vpop.eup %218 }
  0xc1   :  { %153 = vperm.xlu0 %217, %v219_v46   ;;  %v127_v1 = vmul.f32 %v219_v46, %v126_v60 }
  0xc6   :  { %v221_v47 = vpop.eup %220 }
  0xc7   :  { %v129_v48 = vsel %vm128_vm4, %v221_v47, 0.0  ;;  %116 = vperm.xlu1 %216, %v221_v47  }
  0xc8   :  { %v223_v49 = vpop.eup %222  ;;  %v130_v50 = vrot.slane %v129_v48, 4 }
  0xc9   :  { %v136_v51 = vsel %vm128_vm4, %v223_v49, 0.0 }
  0xca   :  { %v131_v52 = vadd.f32 %v130_v50, %v129_v48  ;;  %v137_v53 = vrot.slane %v136_v51, 4 }
  0xcb   :  { %121 = vperm.xlu1 %216, %v223_v49  }
  0xcc   :  { %v132_v54 = vrot.slane %v131_v52, 2  ;;  %v138_v55 = vadd.f32 %v137_v53, %v136_v51 }
  0xce   :  { %v133_v56 = vadd.f32 %v132_v54, %v131_v52  ;;  %v139_v57 = vrot.slane %v138_v55, 2 }
  0xd0   :  { %v134_v58 = vrot.slane %v133_v56, 1  ;;  %v140_v59 = vadd.f32 %v139_v57, %v138_v55 }
  0xd2   :  { %v141_v61 = vrot.slane %v140_v59, 1  ;;  %v135_v62 = vadd.f32 %v134_v58, %v133_v56 }
  0xd4   :  { %v142_v63 = vadd.f32 %v141_v61, %v140_v59 }
  0xd6   :  { %v145_v3 = vsel %vm68_vm3, %v142_v63, %v135_v62 }
  0xd7   :  { %v147_v4 = vadd.f32 %v145_v3, %v127_v1 }
  0xd9   :  { %149 = vst.msk [vmem:[#allocation3] sm:$0x3] %vm30_vm1, %v147_v4 }
  0xe0   :  { %v183_v5 = vld [vmem:[#allocation3] sm:$0x3] }
  0xe1   :  { %224 = vrcp.f32 %v183_v5 }
  0xee   :  { %v225_v6 = vpop.eup %224 }
  0xef   :  { %187 = vperm.xlu1 %216, %v225_v6  }
 0x13c   :  { %v154_v23 = vpop.permute.xlu0 %153 }
 0x13d   :  { %v156_v26 = vmul.f32 %v154_v23, %v150_v22 }
 0x142   :  { %v117_v7 = vpop.permute.xlu1 %116 }
 0x143   :  { %v124_v8 = vmul.f32 %v117_v7, %v296_v0 }
 0x145   :  { %v157_v9 = vsel %vm46_vm0, %v124_v8, 0.0 }
 0x146   :  { %v158_v10 = vrot.slane %v157_v9, 4  ;;  %v122_v11 = vpop.permute.xlu1 %121 }
 0x147   :  { %v125_v12 = vmul.f32 %v122_v11, %v301_v2 }
 0x148   :  { %v159_v13 = vadd.f32 %v158_v10, %v157_v9 }
 0x149   :  { %v164_v14 = vsel %vm46_vm0, %v125_v12, 0.0 }
 0x14a   :  { %v160_v15 = vrot.slane %v159_v13, 2  ;;  %v165_v16 = vrot.slane %v164_v14, 4 }
 0x14c   :  { %v161_v17 = vadd.f32 %v160_v15, %v159_v13  ;;  %v166_v18 = vadd.f32 %v165_v16, %v164_v14 }
 0x14e   :  { %v167_v19 = vrot.slane %v166_v18, 2  ;;  %v162_v20 = vrot.slane %v161_v17, 1 }
 0x150   :  { %v168_v21 = vadd.f32 %v167_v19, %v166_v18  ;;  %v163_v0 = vadd.f32 %v162_v20, %v161_v17 }
 0x152   :  { %v169_v24 = vrot.slane %v168_v21, 1 }
 0x154   :  { %v170_v25 = vadd.f32 %v169_v24, %v168_v21 }
 0x156   :  { %v173_v27 = vsel %vm68_vm3, %v170_v25, %v163_v0 }
 0x157   :  { %v175_v28 = vadd.f32 %v173_v27, %v156_v26 }
 0x159   :  { %177 = vst.msk [vmem:[#allocation4] sm:$0x3] %vm33_vm2, %v175_v28 }
 0x160   :  { %v182_v2 = vld [vmem:[#allocation4] sm:$0x3] }
 0x16a   :  { %v188_v29 = vpop.permute.xlu1 %187 }
 0x16b   :  { %v190_v30 = vmul.f32 %v188_v29, %v182_v2 }
 0x16d   :  { %191 = vst.msk [vmem:[#allocation8] sm:$0x3] %vm33_vm2, %v190_v30 }
 0x16e   :  { %257 = shalt.err (!%p254_p9)
}
 0x16f   :  { %201 = dma.vmem_to_hbm [thread:$0]  %s199_s1, 32, %s326_s2, [#allocation7]  }
 0x170   :  { %268 = dma.done.wait [#allocation7], 32  }
 0x171   :  { %269 = vsyncadd [#allocation7], 4294967264 }
 0x172   :  { %205 = vsyncpa [#allocation6], 1 }
 0x173   :  { %206 = vsyncpa [#allocation7], 1 }

</bundles_post_ra>
